<compile_context>
chip_gen: v7x
topology: tpu7x:2x2x1
jax: 0.10.0
libtpu: 0.0.40
codegen_flags: <defaults>
</compile_context>

<pallas_src>
import functools
import numpy as np
import jax
import jax.numpy as jnp
from jax.experimental import pallas as pl
from jax.experimental.pallas import tpu as pltpu

IGNORE_INDEX = -100
N_SAMPLES = 4
CE_W = 1.0
MSE_W = 1.0
CH_W = 1.0
_BIG = 1e30
_SENTINEL = 1e6        # invalid / padded chamfer points are parked here (far from real data)


def _round_up(x, m):
    return ((x + m - 1) // m) * m


def _chamfer_tiles():
    """Per-generation chamfer tile sizes + VMEM limit (v7x: 64 MiB/TC, v5e/v6e: 128 MiB)."""
    try:
        kind = jax.devices()[0].device_kind.lower()
    except Exception:
        kind = ""
    if ("v7" in kind) or ("tpu7" in kind) or ("7x" in kind):
        return 1024, 1024, 48 * 1024 * 1024
    return 2048, 1024, 64 * 1024 * 1024


# --------------------- Kernel 1: CE + masked MSE (fully parallel over row blocks) ---------------------
def _ce_mse_kernel(logitsT_ref, labels_ref, diffT_ref, ce_ref, sq_ref, cnt_ref, *, ignore_index):
    logits = logitsT_ref[...]                                   # (C, TN): rows on lanes (lane-dense)
    labels = labels_ref[...]                                    # (1, TN) int32; padded tail = ignore_index
    valid = labels != ignore_index                              # (1, TN) bool

    # cross entropy: logsumexp over the class (sublane) axis minus the picked logit
    m = jnp.max(logits, axis=0, keepdims=True)
    lse = m + jnp.log(jnp.sum(jnp.exp(logits - m), axis=0, keepdims=True))
    cls = jax.lax.broadcasted_iota(jnp.int32, logits.shape, 0)
    picked = jnp.sum(jnp.where(cls == labels, logits, 0.0), axis=0, keepdims=True)
    ce_col = jnp.where(valid, lse - picked, 0.0)                # where (not *mask): ragged tail may be inf/NaN

    # masked squared error, summed over the feature (sublane) axis; single pre-diffed stream
    diff = diffT_ref[...]                                       # (D, TN)
    sq_col = jnp.where(valid, jnp.sum(diff * diff, axis=0, keepdims=True), 0.0)

    # per-block partial sums broadcast to a legal (8,128) tile; tiny final combine happens in JAX
    ce_ref[...] = jnp.broadcast_to(jnp.sum(ce_col, keepdims=True), ce_ref.shape)
    sq_ref[...] = jnp.broadcast_to(jnp.sum(sq_col, keepdims=True), sq_ref.shape)
    cnt_ref[...] = jnp.broadcast_to(jnp.sum(valid.astype(jnp.float32), keepdims=True), cnt_ref.shape)


# --------------- Kernel 2: tiled Chamfer (MXU cross term, online min, deferred sqrt) ---------------
def _chamfer_kernel(aneg2_ref, anrm_ref, bT_ref, bnrm_ref, fwd_ref, bwd_ref, minacc):
    j = pl.program_id(1)

    @pl.when(j == 0)
    def _():
        minacc[...] = jnp.full_like(minacc, _BIG)

    # d2 = |a|^2 + |b|^2 - 2 a.b : cross term on the MXU (VPU was the bottleneck).
    # f32 HIGHEST precision keeps the norm-expansion cancellation benign.
    cross = jnp.dot(aneg2_ref[...], bT_ref[...],
                    precision=jax.lax.Precision.HIGHEST,
                    preferred_element_type=jnp.float32)          # (TM, TN)
    d2 = cross + anrm_ref[...] + bnrm_ref[...]                   # two broadcast adds on the VPU

    # forward: per-row running min over column blocks (online accumulator over j); sqrt deferred.
    # TODO(synk): minacc/fwd are 1 lane wide; an XLU transpose to a (1, TM) lane-major accumulator
    # would make the finalize store lane-dense (low priority per review).
    minacc[...] = jnp.minimum(minacc[...], jnp.min(d2, axis=1, keepdims=True))

    # backward: per-column min over this row block; global min over row blocks is a tiny O(M)
    # reduction done in JAX so the row axis stays megacore-parallel.
    colmin = jnp.min(d2, axis=0, keepdims=True)                  # (1, TN)
    bwd_ref[...] = jnp.broadcast_to(colmin, bwd_ref.shape)       # (8, TN) lane-dense store

    @pl.when(j == pl.num_programs(1) - 1)
    def _():
        fwd_ref[...] = jnp.sqrt(jnp.maximum(minacc[...], 0.0))


# ----------------------------- Wrapper (glue in plain JAX) -----------------------------
def reconstruction_loss(logits, outputs, labels, regression_targets,
                        ignore_index=IGNORE_INDEX, ce_weight=CE_W,
                        mse_weight=MSE_W, chamfer_weight=CH_W, n_samples=N_SAMPLES):
    C = logits.shape[-1]
    D = outputs.shape[-1]
    logits2 = logits.reshape(-1, C).astype(jnp.float32)
    labels1 = labels.reshape(-1).astype(jnp.int32)
    out2 = outputs.reshape(-1, D).astype(jnp.float32)
    tgt2 = regression_targets.reshape(-1, D).astype(jnp.float32)
    N = logits2.shape[0]

    # ------------- CE + masked MSE (lane-dense transposed layout, fully parallel grid) -------------
    # TODO(synk): if C were vocab-sized, keep the (N, C) layout instead of transposing.
    n128 = _round_up(N, 128)                      # <=127-row pad only (128-lane quantum)
    tn = 8192 if n128 > 8192 else n128
    nb = (n128 + tn - 1) // tn                    # only the last block may be ragged (reads OOB garbage)
    lab_pad = nb * tn

    if n128 != N:
        logitsT = jnp.pad(logits2, ((0, n128 - N), (0, 0))).T            # (C, n128)
        diffT = jnp.pad(out2 - tgt2, ((0, n128 - N), (0, 0))).T          # (D, n128): one stream
    else:
        logitsT = logits2.T
        diffT = (out2 - tgt2).T
    labels_p = jnp.pad(labels1, (0, lab_pad - N), constant_values=ignore_index)[None, :]

    ce_p, sq_p, cnt_p = pl.pallas_call(
        functools.partial(_ce_mse_kernel, ignore_index=ignore_index),
        out_shape=(jax.ShapeDtypeStruct((8, nb * 128), jnp.float32),
                   jax.ShapeDtypeStruct((8, nb * 128), jnp.float32),
                   jax.ShapeDtypeStruct((8, nb * 128), jnp.float32)),
        grid=(nb,),
        in_specs=[
            pl.BlockSpec((C, tn), lambda n: (0, n)),
            pl.BlockSpec((1, tn), lambda n: (0, n)),
            pl.BlockSpec((D, tn), lambda n: (0, n)),
        ],
        out_specs=(pl.BlockSpec((8, 128), lambda n: (0, n)),
                   pl.BlockSpec((8, 128), lambda n: (0, n)),
                   pl.BlockSpec((8, 128), lambda n: (0, n))),
        compiler_params=pltpu.CompilerParams(
            dimension_semantics=("parallel",),
            vmem_limit_bytes=32 * 1024 * 1024),
    )(logitsT, labels_p, diffT)

    cnt = jnp.sum(cnt_p[0, ::128])
    ce = jnp.sum(ce_p[0, ::128]) / cnt
    mse = jnp.sum(sq_p[0, ::128]) / (cnt * D)

    # ------------- Chamfer over sampled Bezier points -------------
    mask = labels1 != ignore_index
    maskf = mask.astype(jnp.float32)
    n_valid = jnp.sum(mask.astype(jnp.int32))

    # O(N) cumsum/scatter: index of each row's cyclic predecessor among valid rows
    # (== torch.roll over the compacted valid rows), with no data reordering.
    csum_v = jnp.cumsum(mask.astype(jnp.int32))
    csum_i = jnp.cumsum(jnp.logical_not(mask).astype(jnp.int32))
    rank = csum_v - 1
    dest = jnp.where(mask, rank, n_valid + csum_i - 1)
    idx_of_rank = jnp.zeros((N,), jnp.int32).at[dest].set(jnp.arange(N, dtype=jnp.int32))
    prev_rank = jnp.mod(rank - 1, jnp.maximum(n_valid, 1))
    prev_idx = idx_of_rank[prev_rank]

    t = jnp.linspace(0.0, 1.0, n_samples, dtype=jnp.float32)[None, :, None]   # (1, ns, 1)

    def sample(coords):
        p1 = coords[:, 0:2][:, None, :]
        p2 = coords[:, 2:4][:, None, :]
        p3 = coords[:, 4:6][:, None, :]
        p0 = jnp.take(coords, prev_idx, axis=0)[:, 4:6][:, None, :]
        pts = ((1.0 - t) ** 3 * p0 + 3.0 * (1.0 - t) ** 2 * t * p1
               + 3.0 * (1.0 - t) * t ** 2 * p2 + t ** 3 * p3)
        return pts.reshape(-1, 2)                                            # (M, 2)

    # TODO(synk): the Bezier sampling / mask / pad could be fused into the chamfer kernel via a
    # scalar-prefetched prev_idx to save one small HBM round trip (O(M) vs the O(M^2) kernel).
    so = sample(out2)
    st = sample(tgt2)
    pmask = jnp.repeat(maskf, n_samples)                                     # (M,)
    M = N * n_samples

    tm_cap, tn_cap, vmem_cap = _chamfer_tiles()
    tm = tm_cap if M > tm_cap else _round_up(M, 8)
    tn_c = tn_cap if M > tn_cap else _round_up(M, 128)
    m_rows = _round_up(M, tm)
    m_cols = _round_up(M, tn_c)
    n_i = m_rows // tm
    n_j = m_cols // tn_c

    pm_rows = jnp.pad(pmask, (0, m_rows - M))
    pm_cols = jnp.pad(pmask, (0, m_cols - M))

    # Sentinel coordinates replace the per-tile where-masking: invalid/padded points sit far away,
    # so the min never picks them against a real point; padded rows/cols are dropped after the call.
    a_pts = jnp.where(pm_rows[:, None] > 0, jnp.pad(so, ((0, m_rows - M), (0, 0))), _SENTINEL)
    b_pts = jnp.where(pm_cols[:, None] > 0, jnp.pad(st, ((0, m_cols - M), (0, 0))), _SENTINEL)

    # MXU operands: lhs pre-scaled by -2, contraction dim zero-padded 2 -> 8; per-point sq-norms.
    a_neg2 = jnp.pad(-2.0 * a_pts, ((0, 0), (0, 6)))                         # (m_rows, 8)
    bT8 = jnp.pad(b_pts, ((0, 0), (0, 6))).T                                 # (8, m_cols)
    a_nrm = jnp.sum(a_pts * a_pts, axis=1, keepdims=True)                    # (m_rows, 1)
    b_nrm = jnp.sum(b_pts * b_pts, axis=1)[None, :]                          # (1, m_cols)

    fwd_min, bwd_part = pl.pallas_call(
        _chamfer_kernel,
        out_shape=(jax.ShapeDtypeStruct((m_rows, 1), jnp.float32),
                   jax.ShapeDtypeStruct((n_i * 8, m_cols), jnp.float32)),
        grid=(n_i, n_j),
        in_specs=[
            pl.BlockSpec((tm, 8), lambda i, j: (i, 0)),
            pl.BlockSpec((tm, 1), lambda i, j: (i, 0)),
            pl.BlockSpec((8, tn_c), lambda i, j: (0, j)),
            pl.BlockSpec((1, tn_c), lambda i, j: (0, j)),
        ],
        out_specs=(pl.BlockSpec((tm, 1), lambda i, j: (i, 0)),
                   pl.BlockSpec((8, tn_c), lambda i, j: (i, j))),
        scratch_shapes=[pltpu.VMEM((tm, 1), jnp.float32)],
        compiler_params=pltpu.CompilerParams(
            dimension_semantics=("parallel", "arbitrary"),
            vmem_limit_bytes=vmem_cap),
    )(a_neg2, a_nrm, bT8, b_nrm)

    n_pts = n_valid.astype(jnp.float32) * n_samples
    fwd_sum = jnp.sum(fwd_min[:, 0] * pm_rows)                               # apply mask in JAX
    bwd_min = jnp.min(bwd_part, axis=0)                                      # tiny O(M) reduce
    bwd_sum = jnp.sum(jnp.sqrt(jnp.maximum(bwd_min, 0.0)) * pm_cols)
    chamfer = (fwd_sum + bwd_sum) / n_pts

    return ce_weight * ce + mse_weight * mse + chamfer_weight * chamfer


# ----------------------------- NumPy reference (PyTorch semantics) -----------------------------
def _numpy_reference(logits, labels, outputs, regs, ignore_index=IGNORE_INDEX, n_samples=N_SAMPLES):
    valid = labels != ignore_index
    lv = logits[valid]
    lab = labels[valid]
    m = lv.max(-1, keepdims=True)
    lse = m[:, 0] + np.log(np.exp(lv - m).sum(-1))
    ce = (lse - lv[np.arange(len(lab)), lab]).mean()

    ov = outputs[valid]
    tv = regs[valid]
    mse = ((ov - tv) ** 2).mean()

    t = np.linspace(0.0, 1.0, n_samples, dtype=np.float32).reshape(1, -1, 1)

    def sample(coords):
        p1 = coords[:, 0:2][:, None]
        p2 = coords[:, 2:4][:, None]
        p3 = coords[:, 4:6][:, None]
        p0 = np.roll(p3, 1, axis=0)
        pts = ((1 - t) ** 3 * p0 + 3 * (1 - t) ** 2 * t * p1
               + 3 * (1 - t) * t ** 2 * p2 + t ** 3 * p3)
        return pts.reshape(-1, 2)

    so = sample(ov)
    st = sample(tv)
    d = np.sqrt(((so[:, None, :] - st[None, :, :]) ** 2).sum(-1))
    chamfer = d.min(1).mean() + d.min(0).mean()
    return CE_W * ce + MSE_W * mse + CH_W * chamfer


if __name__ == "__main__":
    key = jax.random.PRNGKey(0)
    batch, seq, C, D = 2, 8, 8, 6
    k1, k2, k3, k4, k5 = jax.random.split(key, 5)

    logits = jax.random.normal(k1, (batch, seq, C), dtype=jnp.float32)
    labels = jax.random.randint(k2, (batch, seq), 0, C)
    drop = jax.random.uniform(k3, (batch, seq)) < 0.25
    labels = jnp.where(drop, IGNORE_INDEX, labels)
    labels = labels.at[0, 0].set(3)          # guarantee at least one valid row
    outputs = jax.random.normal(k4, (batch, seq, D), dtype=jnp.float32)
    regs = jax.random.normal(k5, (batch, seq, D), dtype=jnp.float32)

    loss_fn = jax.jit(reconstruction_loss)
    loss = loss_fn(logits, outputs, labels, regs)
    loss = jax.block_until_ready(loss)

    ref = _numpy_reference(
        np.asarray(logits, dtype=np.float32).reshape(-1, C),
        np.asarray(labels, dtype=np.int64).reshape(-1),
        np.asarray(outputs, dtype=np.float32).reshape(-1, D),
        np.asarray(regs, dtype=np.float32).reshape(-1, D),
    )
    np.testing.assert_allclose(float(loss), float(ref), rtol=2e-3, atol=2e-3)
    print("KERNEL_OK")
</pallas_src>

<mosaic_0001>
module attributes {stable_mosaic.version = 11 : i64} {
  func.func @_ce_mse_kernel(%arg0: i32, %arg1: memref<8x128xf32, #tpu.memory_space<vmem>>, %arg2: memref<1x128xi32, #tpu.memory_space<vmem>>, %arg3: memref<6x128xf32, #tpu.memory_space<vmem>>, %arg4: memref<8x128xf32, #tpu.memory_space<vmem>>, %arg5: memref<8x128xf32, #tpu.memory_space<vmem>>, %arg6: memref<8x128xf32, #tpu.memory_space<vmem>>) attributes {dimension_semantics = [#tpu.dimension_semantics<parallel>], iteration_bounds = array<i64: 1>, scalar_prefetch = 0 : i64, scratch_operands = 0 : i64, tpu.core_type = #tpu.core_type<tc>, window_params = [{transform_indices = @transform_0, window_bounds = array<i64: 8, 128>}, {transform_indices = @transform_1, window_bounds = array<i64: 1, 128>}, {transform_indices = @transform_2, window_bounds = array<i64: 6, 128>}, {transform_indices = @transform_3, window_bounds = array<i64: 8, 128>}, {transform_indices = @transform_4, window_bounds = array<i64: 8, 128>}, {transform_indices = @transform_5, window_bounds = array<i64: 8, 128>}]} {
    %c0 = arith.constant 0 : index
    %c0_0 = arith.constant 0 : index
    %0 = vector.load %arg1[%c0, %c0_0] : memref<8x128xf32, #tpu.memory_space<vmem>>, vector<8x128xf32>
    %c0_1 = arith.constant 0 : index
    %c0_2 = arith.constant 0 : index
    %1 = vector.load %arg2[%c0_1, %c0_2] : memref<1x128xi32, #tpu.memory_space<vmem>>, vector<1x128xi32>
    %c-100_i32 = arith.constant -100 : i32
    %2 = vector.broadcast %c-100_i32 : i32 to vector<1x128xi32>
    %3 = arith.cmpi ne, %1, %2 : vector<1x128xi32>
    %cst = arith.constant dense<0xFF800000> : vector<128xf32>
    %4 = vector.multi_reduction <maximumf>, %0, %cst [0] : vector<8x128xf32> to vector<128xf32>
    %5 = vector.shape_cast %4 : vector<128xf32> to vector<1x128xf32>
    %6 = vector.broadcast %5 : vector<1x128xf32> to vector<8x128xf32>
    %7 = arith.subf %0, %6 : vector<8x128xf32>
    %8 = math.exp %7 : vector<8x128xf32>
    %cst_3 = arith.constant dense<0.000000e+00> : vector<128xf32>
    %9 = vector.multi_reduction <add>, %8, %cst_3 [0] : vector<8x128xf32> to vector<128xf32>
    %10 = vector.shape_cast %9 : vector<128xf32> to vector<1x128xf32>
    %11 = math.log %10 : vector<1x128xf32>
    %12 = arith.addf %5, %11 : vector<1x128xf32>
    %13 = tpu.iota {dimensions = array<i32: 0>} : vector<8x128xi32>
    %14 = vector.broadcast %1 : vector<1x128xi32> to vector<8x128xi32>
    %15 = arith.cmpi eq, %13, %14 : vector<8x128xi32>
    %cst_4 = arith.constant 0.000000e+00 : f32
    %16 = vector.broadcast %cst_4 : f32 to vector<8x128xf32>
    %17 = arith.select %15, %0, %16 : vector<8x128xi1>, vector<8x128xf32>
    %cst_5 = arith.constant dense<0.000000e+00> : vector<128xf32>
    %18 = vector.multi_reduction <add>, %17, %cst_5 [0] : vector<8x128xf32> to vector<128xf32>
    %19 = vector.shape_cast %18 : vector<128xf32> to vector<1x128xf32>
    %20 = arith.subf %12, %19 : vector<1x128xf32>
    %cst_6 = arith.constant 0.000000e+00 : f32
    %21 = vector.broadcast %cst_6 : f32 to vector<1x128xf32>
    %22 = arith.select %3, %20, %21 : vector<1x128xi1>, vector<1x128xf32>
    %c0_7 = arith.constant 0 : index
    %c0_8 = arith.constant 0 : index
    %23 = vector.load %arg3[%c0_7, %c0_8] : memref<6x128xf32, #tpu.memory_space<vmem>>, vector<6x128xf32>
    %24 = arith.mulf %23, %23 : vector<6x128xf32>
    %cst_9 = arith.constant dense<0.000000e+00> : vector<128xf32>
    %25 = vector.multi_reduction <add>, %24, %cst_9 [0] : vector<6x128xf32> to vector<128xf32>
    %26 = vector.shape_cast %25 : vector<128xf32> to vector<1x128xf32>
    %cst_10 = arith.constant 0.000000e+00 : f32
    %27 = vector.broadcast %cst_10 : f32 to vector<1x128xf32>
    %28 = arith.select %3, %26, %27 : vector<1x128xi1>, vector<1x128xf32>
    %29 = vector.shape_cast %22 : vector<1x128xf32> to vector<1x1x128xf32>
    %cst_11 = arith.constant dense<0.000000e+00> : vector<1xf32>
    %30 = vector.multi_reduction <add>, %29, %cst_11 [1, 2] : vector<1x1x128xf32> to vector<1xf32>
    %31 = vector.shape_cast %30 : vector<1xf32> to vector<1x1x1xf32>
    %32 = vector.extract %31[0, 0, 0] : f32 from vector<1x1x1xf32>
    %33 = vector.broadcast %32 : f32 to vector<1x1xf32>
    %34 = vector.shape_cast %33 : vector<1x1xf32> to vector<1x1xf32>
    %35 = vector.broadcast %34 : vector<1x1xf32> to vector<8x128xf32>
    %c0_12 = arith.constant 0 : index
    %c0_13 = arith.constant 0 : index
    %36 = vector.load %arg4[%c0_12, %c0_13] : memref<8x128xf32, #tpu.memory_space<vmem>>, vector<8x128xf32>
    tpu.vector_store %arg4[%c0_12, %c0_13], %35 {strides = array<i32>} : memref<8x128xf32, #tpu.memory_space<vmem>>, vector<8x128xf32>,
    %37 = vector.shape_cast %28 : vector<1x128xf32> to vector<1x1x128xf32>
    %cst_14 = arith.constant dense<0.000000e+00> : vector<1xf32>
    %38 = vector.multi_reduction <add>, %37, %cst_14 [1, 2] : vector<1x1x128xf32> to vector<1xf32>
    %39 = vector.shape_cast %38 : vector<1xf32> to vector<1x1x1xf32>
    %40 = vector.extract %39[0, 0, 0] : f32 from vector<1x1x1xf32>
    %41 = vector.broadcast %40 : f32 to vector<1x1xf32>
    %42 = vector.shape_cast %41 : vector<1x1xf32> to vector<1x1xf32>
    %43 = vector.broadcast %42 : vector<1x1xf32> to vector<8x128xf32>
    %c0_15 = arith.constant 0 : index
    %c0_16 = arith.constant 0 : index
    %44 = vector.load %arg5[%c0_15, %c0_16] : memref<8x128xf32, #tpu.memory_space<vmem>>, vector<8x128xf32>
    tpu.vector_store %arg5[%c0_15, %c0_16], %43 {strides = array<i32>} : memref<8x128xf32, #tpu.memory_space<vmem>>, vector<8x128xf32>,
    %45 = arith.extui %3 : vector<1x128xi1> to vector<1x128xi32>
    %46 = arith.sitofp %45 : vector<1x128xi32> to vector<1x128xf32>
    %47 = vector.shape_cast %46 : vector<1x128xf32> to vector<1x1x128xf32>
    %cst_17 = arith.constant dense<0.000000e+00> : vector<1xf32>
    %48 = vector.multi_reduction <add>, %47, %cst_17 [1, 2] : vector<1x1x128xf32> to vector<1xf32>
    %49 = vector.shape_cast %48 : vector<1xf32> to vector<1x1x1xf32>
    %50 = vector.extract %49[0, 0, 0] : f32 from vector<1x1x1xf32>
    %51 = vector.broadcast %50 : f32 to vector<1x1xf32>
    %52 = vector.shape_cast %51 : vector<1x1xf32> to vector<1x1xf32>
    %53 = vector.broadcast %52 : vector<1x1xf32> to vector<8x128xf32>
    %c0_18 = arith.constant 0 : index
    %c0_19 = arith.constant 0 : index
    %54 = vector.load %arg6[%c0_18, %c0_19] : memref<8x128xf32, #tpu.memory_space<vmem>>, vector<8x128xf32>
    tpu.vector_store %arg6[%c0_18, %c0_19], %53 {strides = array<i32>} : memref<8x128xf32, #tpu.memory_space<vmem>>, vector<8x128xf32>,
    return
  }
  func.func @transform_0(%arg0: i32) -> (i32, i32) {
    %c0_i32 = arith.constant 0 : i32
    %c0_i32_0 = arith.constant 0 : i32
    return %c0_i32, %arg0 : i32, i32
  }
  func.func @transform_1(%arg0: i32) -> (i32, i32) {
    %c0_i32 = arith.constant 0 : i32
    %c0_i32_0 = arith.constant 0 : i32
    return %c0_i32, %arg0 : i32, i32
  }
  func.func @transform_2(%arg0: i32) -> (i32, i32) {
    %c0_i32 = arith.constant 0 : i32
    %c0_i32_0 = arith.constant 0 : i32
    return %c0_i32, %arg0 : i32, i32
  }
  func.func @transform_3(%arg0: i32) -> (i32, i32) {
    %c0_i32 = arith.constant 0 : i32
    %c0_i32_0 = arith.constant 0 : i32
    return %c0_i32, %arg0 : i32, i32
  }
  func.func @transform_4(%arg0: i32) -> (i32, i32) {
    %c0_i32 = arith.constant 0 : i32
    %c0_i32_0 = arith.constant 0 : i32
    return %c0_i32, %arg0 : i32, i32
  }
  func.func @transform_5(%arg0: i32) -> (i32, i32) {
    %c0_i32 = arith.constant 0 : i32
    %c0_i32_0 = arith.constant 0 : i32
    return %c0_i32, %arg0 : i32, i32
  }
}

module attributes {stable_mosaic.version = 11 : i64} {
  func.func @_chamfer_kernel(%arg0: i32, %arg1: i32, %arg2: memref<64x8xf32, #tpu.memory_space<vmem>>, %arg3: memref<64x1xf32, #tpu.memory_space<vmem>>, %arg4: memref<8x128xf32, #tpu.memory_space<vmem>>, %arg5: memref<1x128xf32, #tpu.memory_space<vmem>>, %arg6: memref<64x1xf32, #tpu.memory_space<vmem>>, %arg7: memref<8x128xf32, #tpu.memory_space<vmem>>, %arg8: memref<64x1xf32, #tpu.memory_space<vmem>>) attributes {dimension_semantics = [#tpu.dimension_semantics<parallel>, #tpu.dimension_semantics<arbitrary>], iteration_bounds = array<i64: 1, 1>, scalar_prefetch = 0 : i64, scratch_operands = 1 : i64, tpu.core_type = #tpu.core_type<tc>, window_params = [{transform_indices = @transform_0, window_bounds = array<i64: 64, 8>}, {transform_indices = @transform_1, window_bounds = array<i64: 64, 1>}, {transform_indices = @transform_2, window_bounds = array<i64: 8, 128>}, {transform_indices = @transform_3, window_bounds = array<i64: 1, 128>}, {transform_indices = @transform_4, window_bounds = array<i64: 64, 1>}, {transform_indices = @transform_5, window_bounds = array<i64: 8, 128>}]} {
    %c0_i32 = arith.constant 0 : i32
    %0 = arith.cmpi eq, %arg1, %c0_i32 : i32
    %1 = arith.extui %0 : i1 to i32
    %c0_i32_0 = arith.constant 0 : i32
    %2 = arith.cmpi ne, %1, %c0_i32_0 : i32
    scf.if %2 {
      %cst_18 = arith.constant 1.000000e+30 : f32
      %25 = vector.broadcast %cst_18 : f32 to vector<64x1xf32>
      %c0_19 = arith.constant 0 : index
      %c0_20 = arith.constant 0 : index
      %26 = vector.load %arg8[%c0_19, %c0_20] : memref<64x1xf32, #tpu.memory_space<vmem>>, vector<64x1xf32>
      tpu.vector_store %arg8[%c0_19, %c0_20], %25 {strides = array<i32>} : memref<64x1xf32, #tpu.memory_space<vmem>>, vector<64x1xf32>,
    } else {
    }
    %c0 = arith.constant 0 : index
    %c0_1 = arith.constant 0 : index
    %3 = vector.load %arg2[%c0, %c0_1] : memref<64x8xf32, #tpu.memory_space<vmem>>, vector<64x8xf32>
    %c0_2 = arith.constant 0 : index
    %c0_3 = arith.constant 0 : index
    %4 = vector.load %arg4[%c0_2, %c0_3] : memref<8x128xf32, #tpu.memory_space<vmem>>, vector<8x128xf32>
    %cst = arith.constant dense<0.000000e+00> : vector<64x128xf32>
    %5 = tpu.matmul %3, %4, %cst {dimension_numbers = #tpu.dot_dimension_numbers<[1], [0], [0], [1], [0, 0, 1, 1], [], []>, precision = #tpu.contract_precision<fp32>} : vector<64x8xf32>, vector<8x128xf32>, vector<64x128xf32> -> vector<64x128xf32>
    %c0_4 = arith.constant 0 : index
    %c0_5 = arith.constant 0 : index
    %6 = vector.load %arg3[%c0_4, %c0_5] : memref<64x1xf32, #tpu.memory_space<vmem>>, vector<64x1xf32>
    %7 = vector.broadcast %6 : vector<64x1xf32> to vector<64x128xf32>
    %8 = arith.addf %5, %7 : vector<64x128xf32>
    %c0_6 = arith.constant 0 : index
    %c0_7 = arith.constant 0 : index
    %9 = vector.load %arg5[%c0_6, %c0_7] : memref<1x128xf32, #tpu.memory_space<vmem>>, vector<1x128xf32>
    %10 = vector.broadcast %9 : vector<1x128xf32> to vector<64x128xf32>
    %11 = arith.addf %8, %10 : vector<64x128xf32>
    %c0_8 = arith.constant 0 : index
    %c0_9 = arith.constant 0 : index
    %12 = vector.load %arg8[%c0_8, %c0_9] : memref<64x1xf32, #tpu.memory_space<vmem>>, vector<64x1xf32>
    %cst_10 = arith.constant dense<0x7F800000> : vector<64xf32>
    %13 = vector.multi_reduction <minimumf>, %11, %cst_10 [1] : vector<64x128xf32> to vector<64xf32>
    %14 = vector.shape_cast %13 : vector<64xf32> to vector<64x1xf32>
    %15 = arith.minimumf %12, %14 : vector<64x1xf32>
    %c0_11 = arith.constant 0 : index
    %c0_12 = arith.constant 0 : index
    %16 = vector.load %arg8[%c0_11, %c0_12] : memref<64x1xf32, #tpu.memory_space<vmem>>, vector<64x1xf32>
    tpu.vector_store %arg8[%c0_11, %c0_12], %15 {strides = array<i32>} : memref<64x1xf32, #tpu.memory_space<vmem>>, vector<64x1xf32>,
    %cst_13 = arith.constant dense<0x7F800000> : vector<128xf32>
    %17 = vector.multi_reduction <minimumf>, %11, %cst_13 [0] : vector<64x128xf32> to vector<128xf32>
    %18 = vector.shape_cast %17 : vector<128xf32> to vector<1x128xf32>
    %19 = vector.shape_cast %18 : vector<1x128xf32> to vector<1x128xf32>
    %20 = vector.broadcast %19 : vector<1x128xf32> to vector<8x128xf32>
    %c0_14 = arith.constant 0 : index
    %c0_15 = arith.constant 0 : index
    %21 = vector.load %arg7[%c0_14, %c0_15] : memref<8x128xf32, #tpu.memory_space<vmem>>, vector<8x128xf32>
    tpu.vector_store %arg7[%c0_14, %c0_15], %20 {strides = array<i32>} : memref<8x128xf32, #tpu.memory_space<vmem>>, vector<8x128xf32>,
    %c0_i32_16 = arith.constant 0 : i32
    %22 = arith.cmpi eq, %arg1, %c0_i32_16 : i32
    %23 = arith.extui %22 : i1 to i32
    %c0_i32_17 = arith.constant 0 : i32
    %24 = arith.cmpi ne, %23, %c0_i32_17 : i32
    scf.if %24 {
      %c0_18 = arith.constant 0 : index
      %c0_19 = arith.constant 0 : index
      %25 = vector.load %arg8[%c0_18, %c0_19] : memref<64x1xf32, #tpu.memory_space<vmem>>, vector<64x1xf32>
      %cst_20 = arith.constant 0.000000e+00 : f32
      %26 = vector.broadcast %cst_20 : f32 to vector<64x1xf32>
      %27 = arith.maximumf %25, %26 : vector<64x1xf32>
      %28 = math.sqrt %27 : vector<64x1xf32>
      %c0_21 = arith.constant 0 : index
      %c0_22 = arith.constant 0 : index
      %29 = vector.load %arg6[%c0_21, %c0_22] : memref<64x1xf32, #tpu.memory_space<vmem>>, vector<64x1xf32>
      tpu.vector_store %arg6[%c0_21, %c0_22], %28 {strides = array<i32>} : memref<64x1xf32, #tpu.memory_space<vmem>>, vector<64x1xf32>,
    } else {
    }
    return
  }
  func.func @transform_0(%arg0: i32, %arg1: i32) -> (i32, i32) {
    %c0_i32 = arith.constant 0 : i32
    %c0_i32_0 = arith.constant 0 : i32
    return %arg0, %c0_i32 : i32, i32
  }
  func.func @transform_1(%arg0: i32, %arg1: i32) -> (i32, i32) {
    %c0_i32 = arith.constant 0 : i32
    %c0_i32_0 = arith.constant 0 : i32
    return %arg0, %c0_i32 : i32, i32
  }
  func.func @transform_2(%arg0: i32, %arg1: i32) -> (i32, i32) {
    %c0_i32 = arith.constant 0 : i32
    %c0_i32_0 = arith.constant 0 : i32
    return %c0_i32, %arg1 : i32, i32
  }
  func.func @transform_3(%arg0: i32, %arg1: i32) -> (i32, i32) {
    %c0_i32 = arith.constant 0 : i32
    %c0_i32_0 = arith.constant 0 : i32
    return %c0_i32, %arg1 : i32, i32
  }
  func.func @transform_4(%arg0: i32, %arg1: i32) -> (i32, i32) {
    %c0_i32 = arith.constant 0 : i32
    %c0_i32_0 = arith.constant 0 : i32
    return %arg0, %c0_i32 : i32, i32
  }
  func.func @transform_5(%arg0: i32, %arg1: i32) -> (i32, i32) {
    %c0_i32 = arith.constant 0 : i32
    return %arg0, %arg1 : i32, i32
  }
}

</mosaic_0001>

<bundles_post_ra>
// kernel: sub.12
= control target key start
LH: loop header
LB: loop body
LE: loop exit
PB: predicated region body
PF: predicated region fallthrough
CT: control target
= control target key end

     0   :  { %s34_s0 = inlined_call_operand.vmem [shape: f32[16,6], index: 0, kind: input, shape index: {}]   ;;  %s35_s1 = inlined_call_operand.vmem [shape: f32[16,6], index: 1, kind: input, shape index: {}]   ;;  %s36_s2 = inlined_call_operand.vmem [shape: f32[16,6], index: 2, kind: output, shape index: {}]  }
   0x1   :  { %v3_v0 = vld [vmem:[%s34_s0] sm:$0x3f] }
   0x2   :  { %v4_v1 = vld [vmem:[%s35_s1] sm:$0x3f] }
   0x3   :  { %v7_v2 = vsub.f32 %v3_v0, %v4_v1 }
   0x5   :  { %9 = vst [vmem:[%s36_s2] sm:$0xff] %v7_v2 }

// kernel: reconstruction_loss.2
= control target key start
LH: loop header
LB: loop body
LE: loop exit
PB: predicated region body
PF: predicated region fallthrough
CT: control target
= control target key end

     0   :  { %vm65_vm0 = vcmask 1040384   ;;  %v128_v3 = vmov 0.0   ;;  %v38_v9 = vlaneseq  ;;  %vm56_vm3 = vcmask 1045504   ;;  %s183_s1 = inlined_call_operand.vmem [shape: s32[1,128], index: 1, kind: input, shape index: {}]   ;;  %s184_s0 = inlined_call_operand.vmem [shape: f32[8,128], index: 0, kind: input, shape index: {}]   ;;  %s185_s2 = inlined_call_operand.vmem [shape: f32[6,128], index: 2, kind: input, shape index: {}]   ;;  %s186_s3 = inlined_call_operand.vmem [shape: f32[8,128], index: 3, kind: output, shape index: {0}]   ;;  %s187_s4 = inlined_call_operand.vmem [shape: f32[8,128], index: 4, kind: output, shape index: {1}]   ;;  %s188_s5 = inlined_call_operand.vmem [shape: f32[8,128], index: 5, kind: output, shape index: {2}]  }
   0x1   :  { %v18_v0 = vld [vmem:[%s183_s1] sm:$0x1] }
   0x2   :  { %v17_v1 = vld [vmem:[%s184_s0] sm:$0xff]  ;;  %vm19_vm1 = vcmp.ne.s32.totalorder %v18_v0, 4294967196  ;;  %v39_v12 = vshrl.u32 %v38_v9, 7 }
   0x3   :  { %v20_v2 = vrot.slane %v17_v1, 4  ;;  %v116_v4 = vsel %vm19_vm1, 1.0, %v128_v3  ;;  %v54_v17 = vld [vmem:[%s185_s2] sm:$0x3f] }
   0x4   :  { %v92_v5 = vsel %vm65_vm0, %v116_v4, 0.0  ;;  %v42_v15 = vsub.s32 0, %v39_v12  ;;  %v55_v18 = vmul.f32 %v54_v17, %v54_v17 }
   0x5   :  { %v21_v6 = vmax.f32 %v17_v1, %v20_v2  ;;  %93 = vadd.xlane.f32.xlu1 %v92_v5 }
   0x6   :  { %v43_v16 = vrot.slane %v18_v0, %v42_v15  ;;  %v57_v23 = vsel %vm56_vm3, %v55_v18, 0.0 }
   0x7   :  { %v22_v7 = vrot.slane %v21_v6, 2  ;;  %v58_v26 = vrot.slane %v57_v23, 4 }
   0x8   :  { %vm44_vm2 = vcmp.eq.s32.totalorder %v39_v12, %v43_v16 }
   0x9   :  { %v23_v8 = vmax.f32 %v21_v6, %v22_v7  ;;  %v45_v20 = vsel %vm44_vm2, %v17_v1, 0.0  ;;  %v59_v30 = vadd.f32 %v58_v26, %v57_v23 }
   0xa   :  { %v46_v24 = vrot.slane %v45_v20, 4 }
   0xb   :  { %v24_v10 = vrot.slane %v23_v8, 1  ;;  %v60_v33 = vrot.slane %v59_v30, 2 }
   0xc   :  { %v47_v28 = vadd.f32 %v46_v24, %v45_v20 }
   0xd   :  { %v25_v11 = vmax.f32 %v23_v8, %v24_v10  ;;  %v61_v35 = vadd.f32 %v60_v33, %v59_v30 }
   0xe   :  { %v48_v32 = vrot.slane %v47_v28, 2 }
   0xf   :  { %v26_v13 = vsub.f32 %v17_v1, %v25_v11  ;;  %v62_v37 = vrot.slane %v61_v35, 1 }
  0x10   :  { %v49_v34 = vadd.f32 %v48_v32, %v47_v28 }
  0x11   :  { %v27_v14 = vmul.f32 1.442695, %v26_v13  ;;  %v63_v42 = vadd.f32 %v62_v37, %v61_v35 }
  0x12   :  { %v50_v36 = vrot.slane %v49_v34, 1 }
  0x13   :  { %124 = vpow2.f32 %v27_v14  ;;  %v64_v45 = vsel %vm19_vm1, %v63_v42, 0.0 }
  0x14   :  { %v51_v40 = vadd.f32 %v50_v36, %v49_v34  ;;  %v78_v47 = vsel %vm65_vm0, %v64_v45, 0.0 }
  0x1d   :  { %v125_v19 = vpop.eup %124 }
  0x1e   :  { %v29_v21 = vrot.slane %v125_v19, 4 }
  0x20   :  { %v30_v22 = vadd.f32 %v125_v19, %v29_v21 }
  0x22   :  { %v31_v25 = vrot.slane %v30_v22, 2 }
  0x24   :  { %v32_v27 = vadd.f32 %v31_v25, %v30_v22 }
  0x26   :  { %v33_v29 = vrot.slane %v32_v27, 1 }
  0x28   :  { %v34_v31 = vadd.f32 %v33_v29, %v32_v27 }
  0x2a   :  { %126 = vlog2.f32 %v34_v31 }
  0x34   :  { %v127_v38 = vpop.eup %126 }
  0x35   :  { %v36_v39 = vmul.f32 0.6931472, %v127_v38 }
  0x37   :  { %v37_v41 = vadd.f32 %v36_v39, %v25_v11 }
  0x39   :  { %v52_v43 = vsub.f32 %v37_v41, %v51_v40 }
  0x3b   :  { %v53_v44 = vsel %vm19_vm1, %v52_v43, 0.0 }
  0x3c   :  { %v66_v46 = vsel %vm65_vm0, %v53_v44, 0.0 }
  0x3d   :  { %67 = vadd.xlane.f32.xlu0 %v66_v46 }
  0x41   :  { %79 = vadd.xlane.f32.xlu0 %v78_v47 }
  0x92   :  { %v94_v48 = vpop.xlane.xlu1 %93 }
  0x93   :  { %v95_v49 = vrot.slane %v94_v48, 4 }
  0x95   :  { %v96_v50 = vadd.f32 %v95_v49, %v94_v48 }
  0x97   :  { %v97_v54 = vrot.slane %v96_v50, 2 }
  0x99   :  { %v98_v60 = vadd.f32 %v97_v54, %v96_v50 }
  0x9b   :  { %v99_v1 = vrot.slane %v98_v60, 1 }
  0x9d   :  { %v100_v4 = vadd.f32 %v99_v1, %v98_v60 }
  0xca   :  { %v68_v51 = vpop.xlane.xlu0 %67 }
  0xcb   :  { %v69_v52 = vrot.slane %v68_v51, 4 }
  0xcd   :  { %v70_v53 = vadd.f32 %v69_v52, %v68_v51 }
  0xce   :  { %v80_v55 = vpop.xlane.xlu0 %79 }
  0xcf   :  { %v71_v56 = vrot.slane %v70_v53, 2  ;;  %v81_v57 = vrot.slane %v80_v55, 4 }
  0xd1   :  { %v82_v58 = vadd.f32 %v81_v57, %v80_v55  ;;  %v72_v59 = vadd.f32 %v71_v56, %v70_v53 }
  0xd3   :  { %v83_v61 = vrot.slane %v82_v58, 2  ;;  %v73_v62 = vrot.slane %v72_v59, 1 }
  0xd5   :  { %v84_v63 = vadd.f32 %v83_v61, %v82_v58  ;;  %v74_v0 = vadd.f32 %v73_v62, %v72_v59 }
  0xd7   :  { %117 = vpush %v74_v0  ;;  %v85_v2 = vrot.slane %v84_v63, 1 }
  0xd9   :  { %v86_v3 = vadd.f32 %v85_v2, %v84_v63 }
  0xdb   :  { %119 = vpush %v86_v3 }
  0xdc   :  { %121 = vpush %v100_v4 }
 0x108   :  { %s118_s2 = spop %117 }
 0x109   :  { %v76_v5 = vstv %s118_s2 }
 0x10a   :  { %77 = vst [vmem:[%s186_s3] sm:$0xff] %v76_v5 }
 0x10c   :  { %s120_s24 = spop %119 }
 0x10d   :  { %v88_v6 = vstv %s120_s24  ;;  %s122_s25 = spop %121 }
 0x10e   :  { %89 = vst [vmem:[%s187_s4] sm:$0xff] %v88_v6  ;;  %v102_v7 = vstv %s122_s25 }
 0x10f   :  { %103 = vst [vmem:[%s188_s5] sm:$0xff] %v102_v7 }

// kernel: reconstruction_loss.3
= control target key start
LH: loop header
LB: loop body
LE: loop exit
PB: predicated region body
PF: predicated region fallthrough
CT: control target
= control target key end

     0   :  { %11 = vsyncpa [#allocation4], 0  ;;  %s1715_s0 = inlined_call_operand.hbm [shape: f32[64,8], index: 0, kind: input, shape index: {}]   ;;  %s1716_s1 = inlined_call_operand.hbm [shape: f32[64,1], index: 1, kind: input, shape index: {}]   ;;  %s1717_s2 = inlined_call_operand.hbm [shape: f32[8,128], index: 2, kind: input, shape index: {}]   ;;  %s1718_s3 = inlined_call_operand.hbm [shape: f32[1,128], index: 3, kind: input, shape index: {}]   ;;  %s1719_s4 = inlined_call_operand.hbm [shape: f32[64,1], index: 4, kind: output, shape index: {0}]   ;;  %s1720_s5 = inlined_call_operand.hbm [shape: f32[8,128], index: 5, kind: output, shape index: {1}]  }
   0x1   :  { %12 = vsyncpa [#allocation7], 0 }
   0x2   :  { %13 = vsyncpa [#allocation10], 0 }
   0x3   :  { %14 = vsyncpa [#allocation5], 0 }
   0x4   :  { %15 = vsyncpa [#allocation13], 0  ;;  %s1457_s18 = smov [#allocation6]   ;;  %s1458_s20 = smov [#allocation3]  }
   0x5   :  { %s33_s19 = sshll.u32 %s1457_s18, 4  ;;  %s21_s21 = sshll.u32 %s1458_s20, 4  ;;  %s34_s19 = int_to_ptr.vmem [resolvable:$true] %s33_s19  ;;  %s1497_s21 = int_to_ptr.vmem [resolvable:$true] %s21_s21 }
   0x6   :  { %s1315_s24 = scalar_lea.hbm %s1716_s1, 1024 }
   0x7   :  { %p1316_p0 = scmp.ne.s32.totalorder %s1716_s1, %s1315_s24  ;;  %p1319_p1 = scmp.lt.u32.totalorder %s1315_s24, %s1716_s1 }
   0x9   :  { %p1321_p2 = pnand %p1319_p1, %p1316_p0 }
   0xb   :  { %1324 = shalt.err (!%p1321_p2)
}
   0xc   :  { %s1325_s29 = scalar_lea.vmem %s34_s19, 1024  ;;  %p1330_p4 = scmp.lt.s32.totalorder %s34_s19, %s34_s19 }
   0xd   :  { %p1326_p3 = scmp.ne.s32.totalorder %s34_s19, %s1325_s29  ;;  %p1331_p5 = scmp.lt.s32.totalorder %s1325_s29, %s1325_s29 }
   0xf   :  { %p1332_p6 = por %p1331_p5, %p1330_p4 }
  0x11   :  { %p1333_p7 = pnand %p1332_p6, %p1326_p3 }
  0x13   :  { %1336 = shalt.err (!%p1333_p7)
}
  0x14   :  { %s1459_s30 = smov 128   ;;  %s1460_s6 = smov 8  }
  0x15   :  { %39 = dma.hbm_to_vmem [thread:$0]  %s1716_s1, 1024, %s34_s19, [#allocation7], %s1459_s30, %s1459_s30, %s1460_s6  }
  0x16   :  { %s1337_s11 = scalar_lea.hbm %s1715_s0, 1024 }
  0x17   :  { %p1338_p8 = scmp.ne.s32.totalorder %s1715_s0, %s1337_s11  ;;  %p1341_p9 = scmp.lt.u32.totalorder %s1337_s11, %s1715_s0 }
  0x19   :  { %p1343_p10 = pnand %p1341_p9, %p1338_p8 }
  0x1b   :  { %1346 = shalt.err (!%p1343_p10)
}
  0x1c   :  { %s1347_s16 = scalar_lea.vmem %s1497_s21, 1024  ;;  %p1352_p12 = scmp.lt.s32.totalorder %s1497_s21, %s1497_s21 }
  0x1d   :  { %p1348_p11 = scmp.ne.s32.totalorder %s1497_s21, %s1347_s16  ;;  %p1353_p13 = scmp.lt.s32.totalorder %s1347_s16, %s1347_s16 }
  0x1f   :  { %p1354_p0 = por %p1353_p13, %p1352_p12 }
  0x21   :  { %p1355_p1 = pnand %p1354_p0, %p1348_p11 }
  0x23   :  { %1358 = shalt.err (!%p1355_p1)
}
  0x24   :  { %27 = dma.hbm_to_vmem [thread:$0]  %s1715_s0, 1024, %s1497_s21, [#allocation4], %s1459_s30, %s1459_s30, %s1460_s6  }
  0x25   :  { %s1461_s18 = smov [#allocation8]   ;;  %s1462_s20 = smov [#allocation9]  }
  0x26   :  { %s46_s19 = sshll.u32 %s1461_s18, 4  ;;  %s56_s22 = sshll.u32 %s1462_s20, 4  ;;  %s47_s19 = int_to_ptr.vmem [resolvable:$true] %s46_s19  ;;  %s57_s22 = int_to_ptr.vmem [resolvable:$true] %s56_s22 }
  0x27   :  { %s1359_s25 = scalar_lea.hbm %s1717_s2, 128 }
  0x28   :  { %p1360_p2 = scmp.ne.s32.totalorder %s1717_s2, %s1359_s25  ;;  %p1363_p3 = scmp.lt.u32.totalorder %s1359_s25, %s1717_s2 }
  0x2a   :  { %p1365_p4 = pnand %p1363_p3, %p1360_p2 }
  0x2c   :  { %1368 = shalt.err (!%p1365_p4)
}
  0x2d   :  { %s1369_s0 = scalar_lea.vmem %s47_s19, 128  ;;  %p1374_p6 = scmp.lt.s32.totalorder %s47_s19, %s47_s19 }
  0x2e   :  { %p1370_p5 = scmp.ne.s32.totalorder %s47_s19, %s1369_s0  ;;  %p1375_p7 = scmp.lt.s32.totalorder %s1369_s0, %s1369_s0 }
  0x30   :  { %p1376_p8 = por %p1375_p7, %p1374_p6 }
  0x32   :  { %p1377_p9 = pnand %p1376_p8, %p1370_p5 }
  0x34   :  { %1380 = shalt.err (!%p1377_p9)
}
  0x35   :  { %49 = dma.hbm_to_vmem [thread:$0]  %s1717_s2, 128, %s47_s19, [#allocation7]  }
  0x36   :  { %s1381_s10 = scalar_lea.hbm %s1718_s3, 16 }
  0x37   :  { %p1382_p10 = scmp.ne.s32.totalorder %s1718_s3, %s1381_s10  ;;  %p1385_p11 = scmp.lt.u32.totalorder %s1381_s10, %s1718_s3 }
  0x39   :  { %p1387_p12 = pnand %p1385_p11, %p1382_p10 }
  0x3b   :  { %1390 = shalt.err (!%p1387_p12)
}
  0x3c   :  { %s1391_s15 = scalar_lea.vmem %s57_s22, 16  ;;  %s1395_s16 = scalar_lea.vmem %s57_s22, 32 }
  0x3d   :  { %p1392_p13 = scmp.ne.s32.totalorder %s57_s22, %s1391_s15  ;;  %p1396_p0 = scmp.lt.s32.totalorder %s57_s22, %s57_s22 }
  0x3e   :  { %p1397_p1 = scmp.lt.s32.totalorder %s1395_s16, %s1391_s15 }
  0x40   :  { %p1398_p2 = por %p1397_p1, %p1396_p0 }
  0x42   :  { %p1399_p3 = pnand %p1398_p2, %p1392_p13 }
  0x44   :  { %1402 = shalt.err (!%p1399_p3)
}
  0x45   :  { %59 = dma.hbm_to_vmem [thread:$0]  %s1718_s3, 16, %s57_s22, [#allocation10]  }
  0x46   :  { %1447 = dma.done.wait [#allocation4], 1024  }
  0x47   :  { %1448 = vsyncadd [#allocation4], 4294966272 }
  0x48   :  { %1449 = dma.done.wait [#allocation7], 1152  }
  0x49   :  { %1450 = vsyncadd [#allocation7], 4294966144 }
  0x4a   :  { %1451 = dma.done.wait [#allocation10], 16  }
  0x4b   :  { %1452 = vsyncadd [#allocation10], 4294967280  ;;  %v1463_v0 = vmov 0   ;;  %vm142_vm0 = vcmask 64512   ;;  %v93_v1 = vld [vmem:[#allocation8] sm:$0xff]  ;;  %v86_v3 = vld [vmem:[#allocation3 + $0x8] sm:$0xff] }
  0x4c   :  { %1298 = vset.pattern.permute.xlu1 %v1463_v0  ;;  %1297 = vset.pattern.permute.xlu0 %v1463_v0  ;;  %v85_v2 = vld [vmem:[#allocation3] sm:$0xff]  ;;  %v1558_v4 = vand.u32 4294901760, %v93_v1  ;;  %v147_v6 = vsel %vm142_vm0, %v86_v3, 0  ;;  %v87_v7 = vld [vmem:[#allocation3 + $0x10] sm:$0xff]  ;;  %v88_v8 = vld [vmem:[#allocation3 + $0x18] sm:$0xff]  ;;  %vm76_vm1 = vcmask 7168  }
  0x4d   :  { %v144_v5 = vsel %vm142_vm0, %v85_v2, 0  ;;  %v89_v9 = vld [vmem:[#allocation3 + $0x20] sm:$0xff]  ;;  %v1564_v11 = vand.u32 4294901760, %v147_v6  ;;  %v150_v12 = vsel %vm142_vm0, %v87_v7, 0  ;;  %v153_v13 = vsel %vm142_vm0, %v88_v8, 0  ;;  %v90_v14 = vld [vmem:[#allocation3 + $0x28] sm:$0xff] }
  0x4e   :  { %v1562_v10 = vand.u32 4294901760, %v144_v5  ;;  %1197 = vmatprep.subr.mxu0 %v1558_v4  ;;  %1155 = vmatprep.subr.mxu1 %v1558_v4  ;;  %v1571_v15 = vsub.f32 %v93_v1, %v1558_v4  ;;  %v1573_v16 = vand.u32 4294901760, %v150_v12  ;;  %v1575_v17 = vand.u32 4294901760, %v153_v13  ;;  %v91_v19 = vld [vmem:[#allocation3 + $0x30] sm:$0xff]  ;;  %v94_v21 = vld [vmem:[#allocation6] sm:$0xff]  ;;  %v97_v34 = vld [vmem:[#allocation6 + $0x18] sm:$0xff] }
  0x4f   :  { %v156_v18 = vsel %vm142_vm0, %v89_v9, 0  ;;  %v96_v20 = vld [vmem:[#allocation6 + $0x10] sm:$0xff]  ;;  %1198 = vmatpush3.msra.mxu0 %v1558_v4  ;;  %v1583_v23 = vsub.f32 %v147_v6, %v1564_v11  ;;  %1156 = vmatpush3.msra.mxu1 %v1558_v4  ;;  %v159_v25 = vsel %vm142_vm0, %v90_v14, 0  ;;  %v162_v33 = vsel %vm142_vm0, %v91_v19, 0  ;;  %v92_v43 = vld [vmem:[#allocation3 + $0x38] sm:$0xff]  ;;  %v95_v48 = vld [vmem:[#allocation6 + $0x8] sm:$0xff] }
  0x50   :  { %v1580_v22 = vsub.f32 %v144_v5, %v1562_v10  ;;  %v1586_v24 = vand.u32 4294901760, %v156_v18  ;;  %v316_v26 = vand.u32 4294901760, %v1571_v15  ;;  %v1591_v27 = vsub.f32 %v150_v12, %v1573_v16  ;;  %114 = vperm.xlu1 %1298, %v96_v20   ;;  %104 = vperm.xlu0 %1297, %v94_v21   ;;  %v99_v59 = vld [vmem:[#allocation6 + $0x28] sm:$0xff]  ;;  %v98_v60 = vld [vmem:[#allocation6 + $0x20] sm:$0xff]  ;;  %v101_v2 = vld [vmem:[#allocation6 + $0x38] sm:$0xff]  ;;  %s1465_s3 = smov [#allocation12]  }
  0x51   :  { %v1594_v28 = vsub.f32 %v153_v13, %v1575_v17  ;;  %v1596_v29 = vand.u32 4294901760, %v159_v25  ;;  %v245_v31 = vand.u32 4294901760, %v1583_v23  ;;  %v1613_v42 = vand.u32 4294901760, %v162_v33  ;;  %v100_v3 = vld [vmem:[#allocation6 + $0x30] sm:$0xff]  ;;  %v1100_v20 = vld [vmem:[#allocation9] ss:$0 sm:$0xff] }
  0x52   :  { %v235_v30 = vand.u32 4294901760, %v1580_v22  ;;  %v1601_v32 = vsub.f32 %v156_v18, %v1586_v24  ;;  %v317_v35 = vsub.f32 %v1571_v15, %v316_v26  ;;  %v255_v36 = vand.u32 4294901760, %v1591_v27  ;;  %1211 = vmatprep.subr.mxu0 %v316_v26  ;;  %s1085_s17 = sshll.u32 %s1465_s3, 4  ;;  %s1086_s17 = int_to_ptr.vmem [resolvable:$true] %s1085_s17 }
  0x53   :  { %v265_v37 = vand.u32 4294901760, %v1594_v28  ;;  %v1608_v38 = vsub.f32 %v159_v25, %v1596_v29  ;;  %v246_v40 = vsub.f32 %v1583_v23, %v245_v31  ;;  %v1620_v52 = vsub.f32 %v162_v33, %v1613_v42  ;;  %s1403_s18 = scalar_lea.vmem %s1086_s17, 128  ;;  %p1408_p5 = scmp.lt.s32.totalorder %s1086_s17, %s1086_s17 }
  0x54   :  { %1199 = vmatprep.mubr.f32.mxu0 %v235_v30  ;;  %v236_v39 = vsub.f32 %v1580_v22, %v235_v30  ;;  %v275_v41 = vand.u32 4294901760, %v1601_v32  ;;  %v318_v44 = vand.u32 4294901760, %v317_v35  ;;  %v256_v45 = vsub.f32 %v1591_v27, %v255_v36  ;;  %119 = vperm.xlu1 %1298, %v97_v34   ;;  %p1404_p4 = scmp.ne.s32.totalorder %s1086_s17, %s1403_s18  ;;  %p1409_p6 = scmp.lt.s32.totalorder %s1403_s18, %s1403_s18 }
  0x55   :  { %1200 = vmatmul.mubr.f32.vlgmr.msra.gmra.mrb[0].mxu0 %v245_v31  ;;  %v266_v46 = vsub.f32 %v1594_v28, %v265_v37  ;;  %v285_v47 = vand.u32 4294901760, %v1608_v38  ;;  %v247_v50 = vand.u32 4294901760, %v246_v40  ;;  %v165_v54 = vsel %vm142_vm0, %v92_v43, 0  ;;  %109 = vperm.xlu0 %1297, %v95_v48  }
  0x56   :  { %v237_v49 = vand.u32 4294901760, %v236_v39  ;;  %1202 = vmatprep.mubr.f32.mxu0 %v255_v36  ;;  %1212 = vmatpush3.msra.mxu0 %v316_v26  ;;  %v276_v51 = vsub.f32 %v1601_v32, %v275_v41  ;;  %v257_v53 = vand.u32 4294901760, %v256_v45  ;;  %v295_v55 = vand.u32 4294901760, %v1620_v52  ;;  %p1410_p7 = por %p1409_p6, %p1408_p5 }
  0x57   :  { %1169 = vmatprep.subr.mxu1 %v318_v44  ;;  %1225 = vmatprep.subr.mxu0 %v1558_v4  ;;  %v1625_v56 = vand.u32 4294901760, %v165_v54  ;;  %v267_v57 = vand.u32 4294901760, %v266_v46  ;;  %v286_v58 = vsub.f32 %v1608_v38, %v285_v47 }
  0x58   :  { %1157 = vmatprep.mubr.f32.mxu1 %v237_v49  ;;  %v277_v61 = vand.u32 4294901760, %v276_v51  ;;  %v296_v63 = vsub.f32 %v1620_v52, %v295_v55  ;;  %129 = vperm.xlu1 %1298, %v99_v59   ;;  %p1411_p8 = pnand %p1410_p7, %p1404_p4 }
  0x59   :  { %1158 = vmatmul.mubr.f32.vlgmr.msra.gmra.mrb[0].mxu1 %v247_v50  ;;  %1203 = vmatmul.mubr.f32.gmra.mrb[2].mxu0 %v265_v37  ;;  %v304_v62 = vsub.f32 %v165_v54, %v1625_v56  ;;  %v287_v1 = vand.u32 4294901760, %v286_v58 }
  0x5a   :  { %1170 = vmatpush3.msra.mxu1 %v318_v44  ;;  %1160 = vmatprep.mubr.f32.mxu1 %v257_v53  ;;  %v297_v5 = vand.u32 4294901760, %v296_v63 }
  0x5b   :  { %1205 = vmatprep.mubr.f32.mxu0 %v275_v41  ;;  %1183 = vmatprep.subr.mxu1 %v1571_v15  ;;  %v305_v0 = vand.u32 4294901760, %v304_v62 }
  0x5c   :  { %124 = vperm.xlu0 %1297, %v98_v60   ;;  %139 = vperm.xlu1 %1298, %v101_v2  }
  0x5d   :  { %1161 = vmatmul.mubr.f32.gmra.mrb[2].mxu1 %v267_v57  ;;  %1206 = vmatmul.mubr.f32.gmra.mrb[4].mxu0 %v285_v47  ;;  %v306_v6 = vsub.f32 %v304_v62, %v305_v0 }
  0x5e   :  { %1163 = vmatprep.mubr.f32.mxu1 %v277_v61  ;;  %1208 = vmatprep.mubr.f32.mxu0 %v295_v55 }
  0x5f   :  { %v307_v7 = vand.u32 4294901760, %v306_v6 }
  0x60   :  { %134 = vperm.xlu0 %1297, %v100_v3  }
  0x61   :  { %1164 = vmatmul.mubr.f32.gmra.mrb[4].mxu1 %v287_v1  ;;  %1209 = vmatmul.mubr.f32.gmra.mrb[6].mxu0 %v305_v0 }
  0x62   :  { %1166 = vmatprep.mubr.f32.mxu1 %v297_v5  ;;  %1213 = vmatprep.mubr.f32.mxu0 %v1562_v10 }
  0x65   :  { %1167 = vmatmul.mubr.f32.gmra.mrb[6].mxu1 %v307_v7  ;;  %1214 = vmatmul.mubr.f32.vlgmr.msra.gmra.mrb[0].mxu0 %v1564_v11 }
  0x66   :  { %1171 = vmatprep.mubr.f32.mxu1 %v1562_v10  ;;  %1216 = vmatprep.mubr.f32.mxu0 %v1573_v16 }
  0x67   :  { %1226 = vmatpush3.msra.mxu0 %v1558_v4  ;;  %v1464_v4 = vmov 1e+30  }
  0x68   :  { %78 = vst.msk [vmem:[#allocation2 + $0x8] sm:$0xff] %vm76_vm1, %v1464_v4  ;;  %77 = vst.msk [vmem:[#allocation2] sm:$0xff] %vm76_vm1, %v1464_v4 }
  0x69   :  { %1172 = vmatmul.mubr.f32.vlgmr.msra.gmra.mrb[0].mxu1 %v1564_v11  ;;  %1217 = vmatmul.mubr.f32.gmra.mrb[2].mxu0 %v1575_v17  ;;  %79 = vst.msk [vmem:[#allocation2 + $0x10] sm:$0xff] %vm76_vm1, %v1464_v4  ;;  %80 = vst.msk [vmem:[#allocation2 + $0x18] sm:$0xff] %vm76_vm1, %v1464_v4 }
  0x6a   :  { %1184 = vmatpush3.msra.mxu1 %v1571_v15  ;;  %1174 = vmatprep.mubr.f32.mxu1 %v1573_v16  ;;  %81 = vst.msk [vmem:[#allocation2 + $0x20] sm:$0xff] %vm76_vm1, %v1464_v4  ;;  %82 = vst.msk [vmem:[#allocation2 + $0x28] sm:$0xff] %vm76_vm1, %v1464_v4 }
  0x6b   :  { %1219 = vmatprep.mubr.f32.mxu0 %v1586_v24  ;;  %83 = vst.msk [vmem:[#allocation2 + $0x30] sm:$0xff] %vm76_vm1, %v1464_v4  ;;  %84 = vst.msk [vmem:[#allocation2 + $0x38] sm:$0xff] %vm76_vm1, %v1464_v4 }
  0x6d   :  { %1175 = vmatmul.mubr.f32.gmra.mrb[2].mxu1 %v1575_v17  ;;  %1220 = vmatmul.mubr.f32.gmra.mrb[4].mxu0 %v1596_v29 }
  0x6e   :  { %1177 = vmatprep.mubr.f32.mxu1 %v1586_v24  ;;  %1222 = vmatprep.mubr.f32.mxu0 %v1613_v42 }
  0x71   :  { %1178 = vmatmul.mubr.f32.gmra.mrb[4].mxu1 %v1596_v29  ;;  %1223 = vmatmul.mubr.f32.gmra.mrb[6].mxu0 %v1625_v56 }
  0x72   :  { %1180 = vmatprep.mubr.f32.mxu1 %v1613_v42  ;;  %1227 = vmatprep.mubr.f32.mxu0 %v1562_v10 }
  0x75   :  { %1181 = vmatmul.mubr.f32.gmra.mrb[6].mxu1 %v1625_v56  ;;  %1228 = vmatmul.mubr.f32.vlgmr.msra.gmra.mrb[0].mxu0 %v1564_v11 }
  0x76   :  { %1185 = vmatprep.mubr.f32.mxu1 %v1580_v22  ;;  %1230 = vmatprep.mubr.f32.mxu0 %v1573_v16 }
  0x79   :  { %1186 = vmatmul.mubr.f32.vlgmr.msra.gmra.mrb[0].mxu1 %v1583_v23  ;;  %1231 = vmatmul.mubr.f32.gmra.mrb[2].mxu0 %v1575_v17 }
  0x7a   :  { %1188 = vmatprep.mubr.f32.mxu1 %v1591_v27  ;;  %1233 = vmatprep.mubr.f32.mxu0 %v1586_v24 }
  0x7d   :  { %1189 = vmatmul.mubr.f32.gmra.mrb[2].mxu1 %v1594_v28  ;;  %1234 = vmatmul.mubr.f32.gmra.mrb[4].mxu0 %v1596_v29 }
  0x7e   :  { %1191 = vmatprep.mubr.f32.mxu1 %v1601_v32  ;;  %1236 = vmatprep.mubr.f32.mxu0 %v1613_v42 }
  0x81   :  { %1192 = vmatmul.mubr.f32.gmra.mrb[4].mxu1 %v1608_v38  ;;  %1237 = vmatmul.mubr.f32.gmra.mrb[6].mxu0 %v1625_v56 }
  0x82   :  { %1194 = vmatprep.mubr.f32.mxu1 %v1620_v52 }
  0x85   :  { %1195 = vmatmul.mubr.f32.gmra.mrb[6].mxu1 %v304_v62 }
  0xcf   :  { %v115_v8 = vpop.permute.xlu1 %114  ;;  %v105_v9 = vpop.permute.xlu0 %104 }
  0xd3   :  { %v120_v12 = vpop.permute.xlu1 %119 }
  0xd4   :  { %v110_v13 = vpop.permute.xlu0 %109 }
  0xd7   :  { %v130_v29 = vpop.permute.xlu1 %129 }
  0xdb   :  { %v125_v32 = vpop.permute.xlu0 %124  ;;  %v140_v43 = vpop.permute.xlu1 %139 }
  0xdf   :  { %v135_v46 = vpop.permute.xlu0 %134 }
 0x148   :  { %v1229_v10 = vpop.f32.mrb[0].mxu0 }
 0x149   :  { %v868_v11 = vpop.f32.mrb[1].mxu0 }
 0x14c   :  { %v1187_v14 = vpop.f32.mrb[0].mxu1  ;;  %v1232_v15 = vpop.f32.mrb[2].mxu0 }
 0x14d   :  { %v1239_v16 = vadd.f32 %v1187_v14, %v110_v13  ;;  %v501_v17 = vpop.f32.mrb[1].mxu1  ;;  %v880_v18 = vpop.f32.mrb[3].mxu0 }
 0x14e   :  { %v1241_v19 = vadd.f32 %v501_v17, %v105_v9 }
 0x14f   :  { %v1240_v21 = vadd.f32 %v1239_v16, %v1229_v10 }
 0x150   :  { %v1242_v22 = vadd.f32 %v1241_v19, %v868_v11  ;;  %v1190_v23 = vpop.f32.mrb[2].mxu1  ;;  %v1235_v24 = vpop.f32.mrb[4].mxu0 }
 0x151   :  { %v1243_v25 = vadd.f32 %v1190_v23, %v120_v12  ;;  %v515_v26 = vpop.f32.mrb[3].mxu1  ;;  %v892_v27 = vpop.f32.mrb[5].mxu0  ;;  %v922_v28 = vadd.f32 %v1240_v21, %v1100_v20 }
 0x152   :  { %v1245_v30 = vadd.f32 %v515_v26, %v115_v8  ;;  %v921_v31 = vadd.f32 %v1242_v22, %v1100_v20 }
 0x153   :  { %v1244_v33 = vadd.f32 %v1243_v25, %v1232_v15  ;;  %939 = vmin.xlane.f32.xlu1 %v922_v28 }
 0x154   :  { %v1246_v34 = vadd.f32 %v1245_v30, %v880_v18  ;;  %v1238_v35 = vpop.f32.mrb[6].mxu0  ;;  %937 = vmin.xlane.f32.xlu0 %v921_v31  ;;  %v1193_v36 = vpop.f32.mrb[4].mxu1 }
 0x155   :  { %v1247_v37 = vadd.f32 %v1193_v36, %v130_v29  ;;  %v529_v38 = vpop.f32.mrb[5].mxu1  ;;  %v904_v39 = vpop.f32.mrb[7].mxu0  ;;  %v924_v40 = vadd.f32 %v1244_v33, %v1100_v20 }
 0x156   :  { %v1249_v41 = vadd.f32 %v529_v38, %v125_v32  ;;  %v923_v51 = vadd.f32 %v1246_v34, %v1100_v20 }
 0x157   :  { %v1248_v42 = vadd.f32 %v1247_v37, %v1235_v24 }
 0x158   :  { %v1250_v44 = vadd.f32 %v1249_v41, %v892_v27  ;;  %943 = vmin.xlane.f32.xlu0 %v924_v40  ;;  %v1196_v45 = vpop.f32.mrb[6].mxu1 }
 0x159   :  { %v1251_v47 = vadd.f32 %v1196_v45, %v140_v43  ;;  %v543_v48 = vpop.f32.mrb[7].mxu1  ;;  %v926_v49 = vadd.f32 %v1248_v42, %v1100_v20 }
 0x15a   :  { %v1253_v50 = vadd.f32 %v543_v48, %v135_v46  ;;  %v925_v52 = vadd.f32 %v1250_v44, %v1100_v20 }
 0x15b   :  { %v1252_v53 = vadd.f32 %v1251_v47, %v1238_v35  ;;  %v971_v54 = vmin.f32 %v922_v28, %v926_v49 }
 0x15c   :  { %v1254_v55 = vadd.f32 %v1253_v50, %v904_v39  ;;  %941 = vmin.xlane.f32.xlu0 %v923_v51  ;;  %945 = vmin.xlane.f32.xlu1 %v925_v52  ;;  %v970_v56 = vmin.f32 %v921_v31, %v925_v52 }
 0x15d   :  { %v928_v57 = vadd.f32 %v1252_v53, %v1100_v20 }
 0x15e   :  { %v974_v58 = vmin.f32 %v970_v56, %v971_v54  ;;  %v927_v59 = vadd.f32 %v1254_v55, %v1100_v20 }
 0x15f   :  { %v973_v60 = vmin.f32 %v924_v40, %v928_v57 }
 0x160   :  { %947 = vmin.xlane.f32.xlu0 %v926_v49  ;;  %949 = vmin.xlane.f32.xlu1 %v927_v59  ;;  %v972_v61 = vmin.f32 %v923_v51, %v927_v59 }
 0x162   :  { %v975_v62 = vmin.f32 %v972_v61, %v973_v60 }
 0x164   :  { %951 = vmin.xlane.f32.xlu0 %v928_v57  ;;  %v976_v63 = vmin.f32 %v974_v58, %v975_v62 }
 0x166   :  { %v977_v0 = vrot.slane %v976_v63, 4 }
 0x168   :  { %v978_v1 = vmin.f32 %v976_v63, %v977_v0 }
 0x16a   :  { %v979_v2 = vrot.slane %v978_v1, 2 }
 0x16c   :  { %v980_v3 = vmin.f32 %v978_v1, %v979_v2 }
 0x16e   :  { %v981_v5 = vrot.slane %v980_v3, 1 }
 0x170   :  { %v982_v6 = vmin.f32 %v980_v3, %v981_v5 }
 0x172   :  { %983 = vst [vmem:[#allocation12] sm:$0xff] %v982_v6 }
 0x173   :  { %1414 = shalt.err (!%p1411_p8)
}
 0x174   :  { %s1415_s22 = scalar_lea.hbm %s1720_s5, 128 }
 0x175   :  { %p1416_p9 = scmp.ne.s32.totalorder %s1720_s5, %s1415_s22  ;;  %p1419_p10 = scmp.lt.u32.totalorder %s1415_s22, %s1720_s5 }
 0x177   :  { %p1421_p11 = pnand %p1419_p10, %p1416_p9 }
 0x179   :  { %1424 = shalt.err (!%p1421_p11)
}
 0x17a   :  { %1088 = dma.vmem_to_hbm [thread:$0]  %s1086_s17, 128, %s1720_s5, [#allocation13]   ;;  %v930_v7 = vld [vmem:[#allocation2 + $0x8] sm:$0xff]  ;;  %v929_v4 = vld [vmem:[#allocation2] sm:$0xff]  ;;  %v932_v12 = vld [vmem:[#allocation2 + $0x18] sm:$0xff] }
 0x17b   :  { %v931_v15 = vld [vmem:[#allocation2 + $0x10] sm:$0xff]  ;;  %v933_v16 = vld [vmem:[#allocation2 + $0x20] sm:$0xff]  ;;  %v934_v24 = vld [vmem:[#allocation2 + $0x28] sm:$0xff]  ;;  %s1466_s5 = smov [#allocation11]  }
 0x17c   :  { %v935_v25 = vld [vmem:[#allocation2 + $0x30] sm:$0xff]  ;;  %v936_v32 = vld [vmem:[#allocation2 + $0x38] sm:$0xff]  ;;  %s1072_s29 = sshll.u32 %s1466_s5, 4  ;;  %s1073_s29 = int_to_ptr.vmem [resolvable:$true] %s1072_s29 }
 0x17d   :  { %s1425_s0 = scalar_lea.vmem %s1073_s29, 1024  ;;  %p1430_p13 = scmp.lt.s32.totalorder %s1073_s29, %s1073_s29 }
 0x17e   :  { %p1426_p12 = scmp.ne.s32.totalorder %s1073_s29, %s1425_s0  ;;  %p1431_p0 = scmp.lt.s32.totalorder %s1425_s0, %s1425_s0 }
 0x180   :  { %p1432_p1 = por %p1431_p0, %p1430_p13 }
 0x182   :  { %p1433_p2 = pnand %p1432_p1, %p1426_p12 }
 0x1e0   :  { %v940_v8 = vpop.xlane.xlu1 %939 }
 0x1e1   :  { %v954_v9 = vmin.f32 %v930_v7, %v940_v8  ;;  %v938_v10 = vpop.xlane.xlu0 %937 }
 0x1e2   :  { %v953_v11 = vmin.f32 %v929_v4, %v938_v10 }
 0x1e3   :  { %963 = vst.msk [vmem:[#allocation2 + $0x8] sm:$0xff] %vm76_vm1, %v954_v9 }
 0x1e4   :  { %962 = vst.msk [vmem:[#allocation2] sm:$0xff] %vm76_vm1, %v953_v11 }
 0x1e5   :  { %v944_v13 = vpop.xlane.xlu0 %943 }
 0x1e6   :  { %v956_v14 = vmin.f32 %v932_v12, %v944_v13 }
 0x1e8   :  { %965 = vst.msk [vmem:[#allocation2 + $0x18] sm:$0xff] %vm76_vm1, %v956_v14 }
 0x1e9   :  { %v942_v17 = vpop.xlane.xlu0 %941  ;;  %v946_v18 = vpop.xlane.xlu1 %945 }
 0x1ea   :  { %v988_v19 = vld [vmem:[#allocation2 + $0x8] sm:$0xff]  ;;  %v955_v20 = vmin.f32 %v931_v15, %v942_v17  ;;  %v957_v21 = vmin.f32 %v933_v16, %v946_v18 }
 0x1eb   :  { %v996_v22 = vmax.f32 %v988_v19, 0.0  ;;  %v987_v23 = vld [vmem:[#allocation2] sm:$0xff] }
 0x1ec   :  { %v995_v26 = vmax.f32 %v987_v23, 0.0  ;;  %964 = vst.msk [vmem:[#allocation2 + $0x10] sm:$0xff] %vm76_vm1, %v955_v20  ;;  %966 = vst.msk [vmem:[#allocation2 + $0x20] sm:$0xff] %vm76_vm1, %v957_v21 }
 0x1ed   :  { %v948_v27 = vpop.xlane.xlu0 %947  ;;  %v950_v28 = vpop.xlane.xlu1 %949  ;;  %1299 = vrsqrt.f32 %v996_v22  ;;  %vm1012_vm2 = vcmp.eq.f32.partialorder %v996_v22, inf  ;;  %vm1014_vm3 = vcmp.eq.f32.partialorder %v996_v22, 0.0  ;;  %v1015_v48 = vand.u32 2147483648, %v996_v22 }
 0x1ee   :  { %v958_v29 = vmin.f32 %v934_v24, %v948_v27  ;;  %v959_v30 = vmin.f32 %v935_v25, %v950_v28  ;;  %1301 = vrsqrt.f32 %v995_v26  ;;  %vm1005_vm4 = vcmp.eq.f32.partialorder %v995_v26, inf }
 0x1ef   :  { %v990_v31 = vld [vmem:[#allocation2 + $0x18] sm:$0xff]  ;;  %v1008_v49 = vand.u32 2147483648, %v995_v26  ;;  %vm1007_vm5 = vcmp.eq.f32.partialorder %v995_v26, 0.0 }
 0x1f0   :  { %v998_v33 = vmax.f32 %v990_v31, 0.0  ;;  %967 = vst.msk [vmem:[#allocation2 + $0x28] sm:$0xff] %vm76_vm1, %v958_v29  ;;  %968 = vst.msk [vmem:[#allocation2 + $0x30] sm:$0xff] %vm76_vm1, %v959_v30 }
 0x1f1   :  { %v952_v34 = vpop.xlane.xlu0 %951 }
 0x1f2   :  { %v960_v35 = vmin.f32 %v936_v32, %v952_v34  ;;  %1303 = vrsqrt.f32 %v998_v33  ;;  %vm1026_vm6 = vcmp.eq.f32.partialorder %v998_v33, inf  ;;  %v1029_v58 = vand.u32 2147483648, %v998_v33 }
 0x1f3   :  { %v989_v36 = vld [vmem:[#allocation2 + $0x10] sm:$0xff]  ;;  %v991_v37 = vld [vmem:[#allocation2 + $0x20] sm:$0xff]  ;;  %vm1028_vm7 = vcmp.eq.f32.partialorder %v998_v33, 0.0 }
 0x1f4   :  { %v997_v38 = vmax.f32 %v989_v36, 0.0  ;;  %v999_v39 = vmax.f32 %v991_v37, 0.0  ;;  %969 = vst.msk [vmem:[#allocation2 + $0x38] sm:$0xff] %vm76_vm1, %v960_v35 }
 0x1f6   :  { %1305 = vrsqrt.f32 %v997_v38  ;;  %vm1019_vm8 = vcmp.eq.f32.partialorder %v997_v38, inf  ;;  %v1022_v0 = vand.u32 2147483648, %v997_v38  ;;  %vm1021_vm9 = vcmp.eq.f32.partialorder %v997_v38, 0.0 }
 0x1f7   :  { %v1300_v40 = vpop.eup %1299  ;;  %v992_v41 = vld [vmem:[#allocation2 + $0x28] sm:$0xff]  ;;  %v993_v42 = vld [vmem:[#allocation2 + $0x30] sm:$0xff]  ;;  %1307 = vrsqrt.f32 %v999_v39  ;;  %vm1033_vm10 = vcmp.eq.f32.partialorder %v999_v39, inf  ;;  %v1036_v3 = vand.u32 2147483648, %v999_v39  ;;  %vm1035_vm11 = vcmp.eq.f32.partialorder %v999_v39, 0.0 }
 0x1f8   :  { %v1302_v43 = vpop.eup %1301  ;;  %v1000_v44 = vmax.f32 %v992_v41, 0.0  ;;  %v1001_v45 = vmax.f32 %v993_v42, 0.0  ;;  %v1011_v46 = vmul.f32 %v1300_v40, %v996_v22 }
 0x1f9   :  { %v1004_v47 = vmul.f32 %v1302_v43, %v995_v26 }
 0x1fa   :  { %v1013_v50 = vsel %vm1012_vm2, %v996_v22, %v1011_v46  ;;  %1309 = vrsqrt.f32 %v1000_v44  ;;  %vm1040_vm12 = vcmp.eq.f32.partialorder %v1000_v44, inf  ;;  %v1043_v10 = vand.u32 2147483648, %v1000_v44 }
 0x1fb   :  { %v994_v51 = vld [vmem:[#allocation2 + $0x38] sm:$0xff]  ;;  %v1006_v52 = vsel %vm1005_vm4, %v995_v26, %v1004_v47  ;;  %v1016_v53 = vsel %vm1014_vm3, %v1015_v48, %v1013_v50  ;;  %1311 = vrsqrt.f32 %v1001_v45  ;;  %vm1042_vm13 = vcmp.eq.f32.partialorder %v1000_v44, 0.0 }
 0x1fc   :  { %v1304_v54 = vpop.eup %1303  ;;  %v1002_v55 = vmax.f32 %v994_v51, 0.0  ;;  %v1009_v56 = vsel %vm1007_vm5, %v1008_v49, %v1006_v52  ;;  %1060 = vst.msk [vmem:[#allocation11 + $0x8] sm:$0xff] %vm76_vm1, %v1016_v53  ;;  %vm1047_vm14 = vcmp.eq.f32.partialorder %v1001_v45, inf  ;;  %v1050_v13 = vand.u32 2147483648, %v1001_v45 }
 0x1fd   :  { %v1025_v57 = vmul.f32 %v1304_v54, %v998_v33  ;;  %1059 = vst.msk [vmem:[#allocation11] sm:$0xff] %vm76_vm1, %v1009_v56  ;;  %vm1049_vm15 = vcmp.eq.f32.partialorder %v1001_v45, 0.0 }
 0x1fe   :  { %1313 = vrsqrt.f32 %v1002_v55  ;;  %vm1054_vm0 = vcmp.eq.f32.partialorder %v1002_v55, inf  ;;  %v1057_v19 = vand.u32 2147483648, %v1002_v55  ;;  %vm1056_vm2 = vcmp.eq.f32.partialorder %v1002_v55, 0.0 }
 0x1ff   :  { %v1027_v59 = vsel %vm1026_vm6, %v998_v33, %v1025_v57 }
 0x200   :  { %v1306_v60 = vpop.eup %1305  ;;  %v1030_v61 = vsel %vm1028_vm7, %v1029_v58, %v1027_v59 }
 0x201   :  { %v1308_v62 = vpop.eup %1307  ;;  %v1018_v63 = vmul.f32 %v1306_v60, %v997_v38  ;;  %1062 = vst.msk [vmem:[#allocation11 + $0x18] sm:$0xff] %vm76_vm1, %v1030_v61 }
 0x202   :  { %v1032_v1 = vmul.f32 %v1308_v62, %v999_v39 }
 0x203   :  { %v1020_v2 = vsel %vm1019_vm8, %v997_v38, %v1018_v63 }
 0x204   :  { %v1310_v5 = vpop.eup %1309  ;;  %v1023_v6 = vsel %vm1021_vm9, %v1022_v0, %v1020_v2  ;;  %v1034_v7 = vsel %vm1033_vm10, %v999_v39, %v1032_v1 }
 0x205   :  { %v1312_v4 = vpop.eup %1311  ;;  %v1037_v8 = vsel %vm1035_vm11, %v1036_v3, %v1034_v7  ;;  %v1039_v9 = vmul.f32 %v1310_v5, %v1000_v44  ;;  %1061 = vst.msk [vmem:[#allocation11 + $0x10] sm:$0xff] %vm76_vm1, %v1023_v6 }
 0x206   :  { %v1046_v11 = vmul.f32 %v1312_v4, %v1001_v45  ;;  %1063 = vst.msk [vmem:[#allocation11 + $0x20] sm:$0xff] %vm76_vm1, %v1037_v8 }
 0x207   :  { %v1041_v12 = vsel %vm1040_vm12, %v1000_v44, %v1039_v9 }
 0x208   :  { %v1314_v14 = vpop.eup %1313  ;;  %v1044_v15 = vsel %vm1042_vm13, %v1043_v10, %v1041_v12  ;;  %v1048_v16 = vsel %vm1047_vm14, %v1001_v45, %v1046_v11 }
 0x209   :  { %v1051_v17 = vsel %vm1049_vm15, %v1050_v13, %v1048_v16  ;;  %v1053_v18 = vmul.f32 %v1314_v14, %v1002_v55  ;;  %1064 = vst.msk [vmem:[#allocation11 + $0x28] sm:$0xff] %vm76_vm1, %v1044_v15 }
 0x20a   :  { %1065 = vst.msk [vmem:[#allocation11 + $0x30] sm:$0xff] %vm76_vm1, %v1051_v17 }
 0x20b   :  { %v1055_v20 = vsel %vm1054_vm0, %v1002_v55, %v1053_v18 }
 0x20c   :  { %v1058_v21 = vsel %vm1056_vm2, %v1057_v19, %v1055_v20 }
 0x20d   :  { %1066 = vst.msk [vmem:[#allocation11 + $0x38] sm:$0xff] %vm76_vm1, %v1058_v21 }
 0x20e   :  { %1436 = shalt.err (!%p1433_p2)
}
 0x20f   :  { %s1437_s8 = scalar_lea.hbm %s1719_s4, 1024 }
 0x210   :  { %p1438_p3 = scmp.ne.s32.totalorder %s1719_s4, %s1437_s8  ;;  %p1441_p4 = scmp.lt.u32.totalorder %s1437_s8, %s1719_s4 }
 0x212   :  { %p1443_p5 = pnand %p1441_p4, %p1438_p3 }
 0x214   :  { %1446 = shalt.err (!%p1443_p5)
}
 0x215   :  { %1078 = dma.vmem_to_hbm [thread:$0]  %s1073_s29, 1024, %s1719_s4, [#allocation5], %s1459_s30, %s1459_s30, %s1460_s6  }
 0x216   :  { %1453 = dma.done.wait [#allocation5], 1024  }
 0x217   :  { %1454 = vsyncadd [#allocation5], 4294966272 }
 0x218   :  { %1455 = dma.done.wait [#allocation13], 128  }
 0x219   :  { %1456 = vsyncadd [#allocation13], 4294967168 }
 0x21a   :  { %1095 = vsyncpa [#allocation4], 1 }
 0x21b   :  { %1096 = vsyncpa [#allocation7], 1 }
 0x21c   :  { %1097 = vsyncpa [#allocation10], 1 }
 0x21d   :  { %1098 = vsyncpa [#allocation5], 1 }
 0x21e   :  { %1099 = vsyncpa [#allocation13], 1 }

</bundles_post_ra>
